<compile_context>
chip_gen: v6e
topology: v6e:2x2x1
jax: 0.10.0
libtpu: 0.0.40
codegen_flags: <defaults>
</compile_context>

<pallas_src>
import functools

import jax
import jax.numpy as jnp
from jax.experimental import pallas as pl
from jax.experimental.pallas import tpu as pltpu


# ------------------------------- VMEM budget (per generation) ----------------------------
def _default_vmem_limit():
    # ~3/4 of physical per-core VMEM: 96 MiB on v5e/v6e (128 MiB), 48 MiB on v7x (64 MiB).
    try:
        cap = int(pltpu.get_tpu_info().vmem_capacity_bytes)
    except Exception:
        cap = 64 * 1024 * 1024
    return max(32 * 1024 * 1024, (cap * 3) // 4)


_VMEM_LIMIT = _default_vmem_limit()


# ------------- probe pipeline_mode=pl.Buffered(1) support (fall back cleanly) ------------
def _probe_buffered():
    try:
        def _cp(x_ref, o_ref):
            o_ref[...] = x_ref[...]

        x = jnp.zeros((8, 128), jnp.float32)
        pl.pallas_call(
            _cp,
            out_shape=jax.ShapeDtypeStruct((8, 128), jnp.float32),
            grid=(1,),
            in_specs=[pl.BlockSpec((8, 128), lambda i: (0, 0),
                                   pipeline_mode=pl.Buffered(1))],
            out_specs=pl.BlockSpec((8, 128), lambda i: (0, 0)),
        )(x).block_until_ready()
        return True
    except Exception:
        return False


_USE_BUFFERED = _probe_buffered()


def _inv_spec(shape):
    """BlockSpec for an index-invariant (weight/bias) input: fetched once, single-buffered."""
    nd = len(shape)
    if _USE_BUFFERED:
        return pl.BlockSpec(shape, lambda b, t: (0,) * nd, pipeline_mode=pl.Buffered(1))
    return pl.BlockSpec(shape, lambda b, t: (0,) * nd)


# ----------------------------- Kernel A: fused QKV projection ----------------------------
def _qkv_proj_kernel(x_ref, w_ref, b_ref, q_ref, k_ref, v_ref, *, scale):
    e = q_ref.shape[-1]
    # one wide (TS,E)x(E,3E) bf16 MXU matmul, f32 accumulation
    y = jnp.dot(x_ref[0], w_ref[...], preferred_element_type=jnp.float32) + b_ref[...]
    q_ref[0] = (y[:, :e] * scale).astype(q_ref.dtype)        # 1/sqrt(Dh) applied in f32
    k_ref[0] = y[:, e:2 * e].astype(k_ref.dtype)
    v_ref[0] = y[:, 2 * e:].astype(v_ref.dtype)


# --------------- Kernel B: attention + out-proj + LN1 + FFN + LN2 (per q-tile) -----------
def _attn_ffn_kernel(x_ref, q_ref, k_ref, v_ref,
                     wo_ref, bo_ref, w1_ref, b1_ref, w2_ref, b2_ref,
                     g1_ref, be1_ref, g2_ref, be2_ref,
                     out_ref, ctx_ref, *, nhead, eps, s_real, ff_chunk):
    tq, e = q_ref.shape[1], q_ref.shape[2]
    s_pad = k_ref.shape[1]
    dh = e // nhead

    # additive key-padding bias (static decision; only materialized for ragged sequences)
    if s_real < s_pad:
        col = jax.lax.broadcasted_iota(jnp.int32, (1, s_pad), 1)
        kbias = jnp.where(col < s_real, 0.0, -1e30).astype(jnp.float32)
    else:
        kbias = None

    # ---- attention: static loop over heads; Q/K/V arrive pre-projected (bf16) ----------
    for h in range(nhead):
        lo = h * dh
        qh = q_ref[0, :, lo:lo + dh]         # (TQ, Dh) bf16 (already scaled)
        kh = k_ref[0, :, lo:lo + dh]         # (S,  Dh) bf16
        vh = v_ref[0, :, lo:lo + dh]         # (S,  Dh) bf16
        s = jax.lax.dot_general(qh, kh, dimension_numbers=(((1,), (1,)), ((), ())),
                                preferred_element_type=jnp.float32)          # (TQ, S)
        if kbias is not None:
            s = s + kbias
        s = s - jnp.max(s, axis=-1, keepdims=True)
        p = jnp.exp(s)
        p = p * pl.reciprocal(jnp.sum(p, axis=-1, keepdims=True), approx=False)
        ah = jnp.dot(p.astype(jnp.bfloat16), vh, preferred_element_type=jnp.float32)
        ctx_ref[:, lo:lo + dh] = ah.astype(ctx_ref.dtype)
    # TODO(synk): for very long S switch to a K/V-tiled online-softmax (flash-style) loop
    # instead of materializing the full (TQ, S) f32 score matrix per head.

    # ---- out-projection (one full-width matmul) + residual + LayerNorm1 -----------------
    attn = jnp.dot(ctx_ref[...], wo_ref[...], preferred_element_type=jnp.float32) + bo_ref[...]
    h1 = x_ref[0] + attn
    mu1 = jnp.mean(h1, axis=-1, keepdims=True)
    var1 = jnp.mean((h1 - mu1) ** 2, axis=-1, keepdims=True)
    x1 = (h1 - mu1) * jax.lax.rsqrt(var1 + eps) * g1_ref[...] + be1_ref[...]
    x1b = x1.astype(jnp.bfloat16)

    # ---- FFN (Dff-chunked via fori_loop for large Dff) + residual + LayerNorm2 ----------
    dff = w1_ref.shape[1]
    if dff > ff_chunk and dff % ff_chunk == 0 and ff_chunk % 128 == 0:
        def body(c, ff):
            off = pl.multiple_of(c * ff_chunk, 128)
            hc = (jnp.dot(x1b, w1_ref[:, pl.ds(off, ff_chunk)],
                          preferred_element_type=jnp.float32)
                  + b1_ref[:, pl.ds(off, ff_chunk)])
            hc = jnp.maximum(hc, 0.0)
            return ff + jnp.dot(hc.astype(jnp.bfloat16), w2_ref[pl.ds(off, ff_chunk), :],
                                preferred_element_type=jnp.float32)
        ff = jax.lax.fori_loop(0, dff // ff_chunk, body, jnp.zeros((tq, e), jnp.float32))
    else:
        hc = jnp.dot(x1b, w1_ref[...], preferred_element_type=jnp.float32) + b1_ref[...]
        hc = jnp.maximum(hc, 0.0)
        ff = jnp.dot(hc.astype(jnp.bfloat16), w2_ref[...], preferred_element_type=jnp.float32)

    h2 = x1 + ff + b2_ref[...]
    mu2 = jnp.mean(h2, axis=-1, keepdims=True)
    var2 = jnp.mean((h2 - mu2) ** 2, axis=-1, keepdims=True)
    out_ref[0] = ((h2 - mu2) * jax.lax.rsqrt(var2 + eps) * g2_ref[...]
                  + be2_ref[...]).astype(out_ref.dtype)


# ------------------------------------ one encoder layer ----------------------------------
def _encoder_layer(x, kp, *, nhead, eps, tq, s_real, ff_chunk):
    B, S_pad, E = x.shape
    n_t = S_pad // tq
    dff = kp["w1"].shape[1]

    # ---- kernel A: QKV computed exactly once per token ---------------------------------
    qkv_kernel = functools.partial(_qkv_proj_kernel, scale=float(E // nhead) ** -0.5)
    q, k, v = pl.pallas_call(
        qkv_kernel,
        out_shape=(jax.ShapeDtypeStruct((B, S_pad, E), jnp.bfloat16),) * 3,
        grid=(B, n_t),
        in_specs=[
            pl.BlockSpec((1, tq, E), lambda b, t: (b, t, 0)),      # x tile (bf16)
            _inv_spec((E, 3 * E)),                                 # in-proj weight^T
            _inv_spec((1, 3 * E)),                                 # in-proj bias
        ],
        out_specs=(pl.BlockSpec((1, tq, E), lambda b, t: (b, t, 0)),) * 3,
        compiler_params=pltpu.CompilerParams(
            dimension_semantics=("parallel", "parallel"),
            vmem_limit_bytes=_VMEM_LIMIT),
    )(x.astype(jnp.bfloat16), kp["wqkv"], kp["bqkv"])

    # ---- kernel B: attention + epilogue per (batch, q-tile) ----------------------------
    attn_kernel = functools.partial(_attn_ffn_kernel, nhead=nhead, eps=eps,
                                    s_real=s_real, ff_chunk=ff_chunk)
    return pl.pallas_call(
        attn_kernel,
        out_shape=jax.ShapeDtypeStruct((B, S_pad, E), jnp.float32),
        grid=(B, n_t),
        in_specs=[
            pl.BlockSpec((1, tq, E), lambda b, t: (b, t, 0)),       # residual x tile (f32)
            pl.BlockSpec((1, tq, E), lambda b, t: (b, t, 0)),       # Q tile (bf16, scaled)
            pl.BlockSpec((1, S_pad, E), lambda b, t: (b, 0, 0)),    # K (bf16, once per batch)
            pl.BlockSpec((1, S_pad, E), lambda b, t: (b, 0, 0)),    # V (bf16, once per batch)
            _inv_spec((E, E)), _inv_spec((1, E)),                   # Wo^T, bo
            _inv_spec((E, dff)), _inv_spec((1, dff)),               # W1^T, b1
            _inv_spec((dff, E)), _inv_spec((1, E)),                 # W2^T, b2
            _inv_spec((1, E)), _inv_spec((1, E)),                   # norm1 gamma, beta
            _inv_spec((1, E)), _inv_spec((1, E)),                   # norm2 gamma, beta
        ],
        out_specs=pl.BlockSpec((1, tq, E), lambda b, t: (b, t, 0)),
        scratch_shapes=[pltpu.VMEM((tq, E), jnp.bfloat16)],         # per-head context
        compiler_params=pltpu.CompilerParams(
            dimension_semantics=("parallel", "parallel"),
            vmem_limit_bytes=_VMEM_LIMIT),
    )(x, q, k, v, kp["wo"], kp["bo"], kp["w1"], kp["b1"], kp["w2"], kp["b2"],
      kp["g1"], kp["be1"], kp["g2"], kp["be2"])


# ----------------------------- PyTorch-layout params -> kernel layout --------------------
def _prepare_layer(p, nhead):
    E = p["out_proj_weight"].shape[0]
    bf16, f32 = jnp.bfloat16, jnp.float32
    return {
        "wqkv": p["in_proj_weight"].T.astype(bf16),                # (E, 3E): x@wqkv = [q|k|v]
        "bqkv": p["in_proj_bias"].reshape(1, -1).astype(f32),
        "wo": p["out_proj_weight"].T.astype(bf16),                 # (E, E)
        "bo": p["out_proj_bias"].reshape(1, E).astype(f32),
        "w1": p["linear1_weight"].T.astype(bf16),                  # (E, Dff)
        "b1": p["linear1_bias"].reshape(1, -1).astype(f32),
        "w2": p["linear2_weight"].T.astype(bf16),                  # (Dff, E)
        "b2": p["linear2_bias"].reshape(1, E).astype(f32),
        "g1": p["norm1_weight"].reshape(1, E).astype(f32),
        "be1": p["norm1_bias"].reshape(1, E).astype(f32),
        "g2": p["norm2_weight"].reshape(1, E).astype(f32),
        "be2": p["norm2_bias"].reshape(1, E).astype(f32),
    }


def transformer_encoder_pallas(src, layer_params, *, nhead, eps=1e-5, q_tile=128,
                               ff_chunk=512):
    """src: (S, N, E) — PyTorch default (batch_first=False). norm=None, masks=None."""
    # TODO(synk): src_mask / src_key_padding_mask and the nested-tensor fast path are not
    # implemented (mask=None, enable_nested_tensor=False); dropout is identity (eval mode).
    x = jnp.transpose(src, (1, 0, 2))                      # (B, S, E)
    B, S, E = x.shape
    assert E % nhead == 0, "d_model must be divisible by nhead"

    q_tile = max(16, (q_tile // 16) * 16)                  # keep sublane packing friendly
    if S > q_tile:
        tq = q_tile
        s_pad = pl.cdiv(S, tq) * tq
    else:
        s_pad = pl.cdiv(S, 16) * 16
        tq = s_pad
    if s_pad != S:                                         # pad once for the whole stack;
        x = jnp.pad(x, ((0, 0), (0, s_pad - S), (0, 0)))   # padded keys masked in-kernel

    for p in layer_params:                                 # sequential stack of layers
        x = _encoder_layer(x, _prepare_layer(p, nhead), nhead=nhead, eps=eps,
                           tq=tq, s_real=S, ff_chunk=ff_chunk)

    if s_pad != S:
        x = x[:, :S, :]
    return jnp.transpose(x, (1, 0, 2))                     # back to (S, N, E)


# ----------------------------- pure-JAX reference (correctness check) --------------------
def _layer_ref(x, p, nhead, eps=1e-5):
    B, S, E = x.shape
    Dh = E // nhead
    qkv = x @ p["in_proj_weight"].T + p["in_proj_bias"]
    q, k, v = qkv[..., :E], qkv[..., E:2 * E], qkv[..., 2 * E:]
    q = q.reshape(B, S, nhead, Dh).transpose(0, 2, 1, 3)
    k = k.reshape(B, S, nhead, Dh).transpose(0, 2, 1, 3)
    v = v.reshape(B, S, nhead, Dh).transpose(0, 2, 1, 3)
    s = jnp.einsum("bhqd,bhkd->bhqk", q, k) / (Dh ** 0.5)
    a = jnp.einsum("bhqk,bhkd->bhqd", jax.nn.softmax(s, -1), v)
    a = a.transpose(0, 2, 1, 3).reshape(B, S, E)
    a = a @ p["out_proj_weight"].T + p["out_proj_bias"]

    def ln(h, g, b):
        mu = jnp.mean(h, -1, keepdims=True)
        var = jnp.mean((h - mu) ** 2, -1, keepdims=True)
        return (h - mu) * jax.lax.rsqrt(var + eps) * g + b

    x1 = ln(x + a, p["norm1_weight"], p["norm1_bias"])
    ff = jnp.maximum(x1 @ p["linear1_weight"].T + p["linear1_bias"], 0.0)
    ff = ff @ p["linear2_weight"].T + p["linear2_bias"]
    return ln(x1 + ff, p["norm2_weight"], p["norm2_bias"])


def transformer_encoder_ref(src, layer_params, *, nhead):
    x = jnp.transpose(src, (1, 0, 2))
    for p in layer_params:
        x = _layer_ref(x, p, nhead)
    return jnp.transpose(x, (1, 0, 2))


# ----------------------------- deterministic parameter construction ----------------------
def make_layer_params(key, d_model, dim_ff):
    ks = jax.random.split(key, 8)

    def xav(k, shape):
        bound = (6.0 / (shape[0] + shape[1])) ** 0.5
        return jax.random.uniform(k, shape, jnp.float32, -bound, bound)

    return {
        # PyTorch-convention layouts (out_features, in_features)
        "in_proj_weight": xav(ks[0], (3 * d_model, d_model)),
        "in_proj_bias": 0.01 * jax.random.normal(ks[1], (3 * d_model,), jnp.float32),
        "out_proj_weight": xav(ks[2], (d_model, d_model)),
        "out_proj_bias": 0.01 * jax.random.normal(ks[3], (d_model,), jnp.float32),
        "linear1_weight": xav(ks[4], (dim_ff, d_model)),
        "linear1_bias": 0.01 * jax.random.normal(ks[5], (dim_ff,), jnp.float32),
        "linear2_weight": xav(ks[6], (d_model, dim_ff)),
        "linear2_bias": 0.01 * jax.random.normal(ks[7], (d_model,), jnp.float32),
        "norm1_weight": jnp.ones((d_model,), jnp.float32),
        "norm1_bias": jnp.zeros((d_model,), jnp.float32),
        "norm2_weight": jnp.ones((d_model,), jnp.float32),
        "norm2_bias": jnp.zeros((d_model,), jnp.float32),
    }


if __name__ == "__main__":
    NHEAD, DFF, NUM_LAYERS = 4, 64, 2
    B, E = 2, 32
    root = jax.random.PRNGKey(0)
    key_a, key_b = jax.random.split(root)

    # --- Test 1: short sequence (single query tile; S=8 padded to 16, keys masked) -------
    S = 8
    ks, *kl = jax.random.split(key_a, 1 + NUM_LAYERS)
    src = jax.random.normal(ks, (S, B, E), jnp.float32)     # (S, N, E), PyTorch default
    params = [make_layer_params(k, E, DFF) for k in kl]
    out = jax.block_until_ready(transformer_encoder_pallas(src, params, nhead=NHEAD))
    ref = transformer_encoder_ref(src, params, nhead=NHEAD)
    assert out.shape == src.shape
    # bf16 matmul operands (f32 accumulation) loosen the tolerance vs the f32 reference.
    assert jnp.allclose(out, ref, atol=2e-1, rtol=5e-2), "test1: mismatch vs reference"

    # --- Test 2: ragged sequence with multiple query tiles (S=24, q_tile=16 -> pad 32) ---
    S = 24
    ks, *kl = jax.random.split(key_b, 1 + NUM_LAYERS)
    src = jax.random.normal(ks, (S, B, E), jnp.float32)
    params = [make_layer_params(k, E, DFF) for k in kl]
    out = jax.block_until_ready(
        transformer_encoder_pallas(src, params, nhead=NHEAD, q_tile=16))
    ref = transformer_encoder_ref(src, params, nhead=NHEAD)
    assert out.shape == src.shape
    assert jnp.allclose(out, ref, atol=2e-1, rtol=5e-2), "test2: mismatch vs reference"

    print("KERNEL_OK")
</pallas_src>

<mosaic_0001>
module attributes {stable_mosaic.version = 11 : i64} {
  func.func @_cp(%arg0: i32, %arg1: memref<8x128xf32, #tpu.memory_space<vmem>>, %arg2: memref<8x128xf32, #tpu.memory_space<vmem>>) attributes {dimension_semantics = [#tpu.dimension_semantics<arbitrary>], iteration_bounds = array<i64: 1>, scalar_prefetch = 0 : i64, scratch_operands = 0 : i64, tpu.core_type = #tpu.core_type<tc>, window_params = [{pipeline_mode = #tpu.pipeline_mode<synchronous>, transform_indices = @transform_0, window_bounds = array<i64: 8, 128>}, {pipeline_mode = #tpu.pipeline_mode<synchronous>, transform_indices = @transform_1, window_bounds = array<i64: 8, 128>}]} {
    %c0 = arith.constant 0 : index
    %c0_0 = arith.constant 0 : index
    %0 = vector.load %arg1[%c0, %c0_0] : memref<8x128xf32, #tpu.memory_space<vmem>>, vector<8x128xf32>
    %c0_1 = arith.constant 0 : index
    %c0_2 = arith.constant 0 : index
    %1 = vector.load %arg2[%c0_1, %c0_2] : memref<8x128xf32, #tpu.memory_space<vmem>>, vector<8x128xf32>
    tpu.vector_store %arg2[%c0_1, %c0_2], %0 {strides = array<i32>} : memref<8x128xf32, #tpu.memory_space<vmem>>, vector<8x128xf32>,
    return
  }
  func.func @transform_0(%arg0: i32) -> (i32, i32) {
    %c0_i32 = arith.constant 0 : i32
    %c0_i32_0 = arith.constant 0 : i32
    %c0_i32_1 = arith.constant 0 : i32
    return %c0_i32, %c0_i32_0 : i32, i32
  }
  func.func @transform_1(%arg0: i32) -> (i32, i32) {
    %c0_i32 = arith.constant 0 : i32
    %c0_i32_0 = arith.constant 0 : i32
    %c0_i32_1 = arith.constant 0 : i32
    return %c0_i32, %c0_i32_0 : i32, i32
  }
}

module attributes {stable_mosaic.version = 11 : i64} {
  func.func @_qkv_proj_kernel(%arg0: i32, %arg1: i32, %arg2: memref<1x16x32xbf16, #tpu.memory_space<vmem>>, %arg3: memref<32x96xbf16, #tpu.memory_space<vmem>>, %arg4: memref<1x96xf32, #tpu.memory_space<vmem>>, %arg5: memref<1x16x32xbf16, #tpu.memory_space<vmem>>, %arg6: memref<1x16x32xbf16, #tpu.memory_space<vmem>>, %arg7: memref<1x16x32xbf16, #tpu.memory_space<vmem>>) attributes {dimension_semantics = [#tpu.dimension_semantics<parallel>, #tpu.dimension_semantics<parallel>], iteration_bounds = array<i64: 2, 1>, scalar_prefetch = 0 : i64, scratch_operands = 0 : i64, tpu.core_type = #tpu.core_type<tc>, window_params = [{transform_indices = @transform_0, window_bounds = array<i64: 1, 16, 32>}, {pipeline_mode = #tpu.pipeline_mode<synchronous>, transform_indices = @transform_1, window_bounds = array<i64: 32, 96>}, {pipeline_mode = #tpu.pipeline_mode<synchronous>, transform_indices = @transform_2, window_bounds = array<i64: 1, 96>}, {transform_indices = @transform_3, window_bounds = array<i64: 1, 16, 32>}, {transform_indices = @transform_4, window_bounds = array<i64: 1, 16, 32>}, {transform_indices = @transform_5, window_bounds = array<i64: 1, 16, 32>}]} {
    %c0 = arith.constant 0 : index
    %c0_0 = arith.constant 0 : index
    %c0_1 = arith.constant 0 : index
    %0 = vector.load %arg2[%c0, %c0_0, %c0_1] : memref<1x16x32xbf16, #tpu.memory_space<vmem>>, vector<1x16x32xbf16>
    %1 = vector.shape_cast %0 : vector<1x16x32xbf16> to vector<16x32xbf16>
    %c0_2 = arith.constant 0 : index
    %c0_3 = arith.constant 0 : index
    %2 = vector.load %arg3[%c0_2, %c0_3] : memref<32x96xbf16, #tpu.memory_space<vmem>>, vector<32x96xbf16>
    %cst = arith.constant dense<0.000000e+00> : vector<16x96xf32>
    %3 = tpu.matmul %1, %2, %cst {dimension_numbers = #tpu.dot_dimension_numbers<[1], [0], [0], [1], [0, 0, 1, 1], [], []>} : vector<16x32xbf16>, vector<32x96xbf16>, vector<16x96xf32> -> vector<16x96xf32>
    %c0_4 = arith.constant 0 : index
    %c0_5 = arith.constant 0 : index
    %4 = vector.load %arg4[%c0_4, %c0_5] : memref<1x96xf32, #tpu.memory_space<vmem>>, vector<1x96xf32>
    %5 = vector.broadcast %4 : vector<1x96xf32> to vector<16x96xf32>
    %6 = arith.addf %3, %5 : vector<16x96xf32>
    %7 = vector.extract_strided_slice %6 {offsets = [0, 0], sizes = [16, 32], strides = [1, 1]} : vector<16x96xf32> to vector<16x32xf32>
    %cst_6 = arith.constant 0.353553385 : f32
    %8 = vector.broadcast %cst_6 : f32 to vector<16x32xf32>
    %9 = arith.mulf %7, %8 : vector<16x32xf32>
    %10 = arith.truncf %9 : vector<16x32xf32> to vector<16x32xbf16>
    %c0_7 = arith.constant 0 : index
    %c0_8 = arith.constant 0 : index
    %c0_9 = arith.constant 0 : index
    %11 = vector.load %arg5[%c0_7, %c0_8, %c0_9] : memref<1x16x32xbf16, #tpu.memory_space<vmem>>, vector<1x16x32xbf16>
    %12 = vector.shape_cast %11 : vector<1x16x32xbf16> to vector<16x32xbf16>
    %13 = vector.shape_cast %10 : vector<16x32xbf16> to vector<1x16x32xbf16>
    tpu.vector_store %arg5[%c0_7, %c0_8, %c0_9], %13 {strides = array<i32>} : memref<1x16x32xbf16, #tpu.memory_space<vmem>>, vector<1x16x32xbf16>,
    %14 = vector.extract_strided_slice %6 {offsets = [0, 32], sizes = [16, 32], strides = [1, 1]} : vector<16x96xf32> to vector<16x32xf32>
    %15 = arith.truncf %14 : vector<16x32xf32> to vector<16x32xbf16>
    %c0_10 = arith.constant 0 : index
    %c0_11 = arith.constant 0 : index
    %c0_12 = arith.constant 0 : index
    %16 = vector.load %arg6[%c0_10, %c0_11, %c0_12] : memref<1x16x32xbf16, #tpu.memory_space<vmem>>, vector<1x16x32xbf16>
    %17 = vector.shape_cast %16 : vector<1x16x32xbf16> to vector<16x32xbf16>
    %18 = vector.shape_cast %15 : vector<16x32xbf16> to vector<1x16x32xbf16>
    tpu.vector_store %arg6[%c0_10, %c0_11, %c0_12], %18 {strides = array<i32>} : memref<1x16x32xbf16, #tpu.memory_space<vmem>>, vector<1x16x32xbf16>,
    %19 = vector.extract_strided_slice %6 {offsets = [0, 64], sizes = [16, 32], strides = [1, 1]} : vector<16x96xf32> to vector<16x32xf32>
    %20 = arith.truncf %19 : vector<16x32xf32> to vector<16x32xbf16>
    %c0_13 = arith.constant 0 : index
    %c0_14 = arith.constant 0 : index
    %c0_15 = arith.constant 0 : index
    %21 = vector.load %arg7[%c0_13, %c0_14, %c0_15] : memref<1x16x32xbf16, #tpu.memory_space<vmem>>, vector<1x16x32xbf16>
    %22 = vector.shape_cast %21 : vector<1x16x32xbf16> to vector<16x32xbf16>
    %23 = vector.shape_cast %20 : vector<16x32xbf16> to vector<1x16x32xbf16>
    tpu.vector_store %arg7[%c0_13, %c0_14, %c0_15], %23 {strides = array<i32>} : memref<1x16x32xbf16, #tpu.memory_space<vmem>>, vector<1x16x32xbf16>,
    return
  }
  func.func @transform_0(%arg0: i32, %arg1: i32) -> (i32, i32, i32) {
    %c0_i32 = arith.constant 0 : i32
    %c0_i32_0 = arith.constant 0 : i32
    return %arg0, %arg1, %c0_i32 : i32, i32, i32
  }
  func.func @transform_1(%arg0: i32, %arg1: i32) -> (i32, i32) {
    %c0_i32 = arith.constant 0 : i32
    %c0_i32_0 = arith.constant 0 : i32
    %c0_i32_1 = arith.constant 0 : i32
    return %c0_i32, %c0_i32_0 : i32, i32
  }
  func.func @transform_2(%arg0: i32, %arg1: i32) -> (i32, i32) {
    %c0_i32 = arith.constant 0 : i32
    %c0_i32_0 = arith.constant 0 : i32
    %c0_i32_1 = arith.constant 0 : i32
    return %c0_i32, %c0_i32_0 : i32, i32
  }
  func.func @transform_3(%arg0: i32, %arg1: i32) -> (i32, i32, i32) {
    %c0_i32 = arith.constant 0 : i32
    %c0_i32_0 = arith.constant 0 : i32
    return %arg0, %arg1, %c0_i32 : i32, i32, i32
  }
  func.func @transform_4(%arg0: i32, %arg1: i32) -> (i32, i32, i32) {
    %c0_i32 = arith.constant 0 : i32
    %c0_i32_0 = arith.constant 0 : i32
    return %arg0, %arg1, %c0_i32 : i32, i32, i32
  }
  func.func @transform_5(%arg0: i32, %arg1: i32) -> (i32, i32, i32) {
    %c0_i32 = arith.constant 0 : i32
    %c0_i32_0 = arith.constant 0 : i32
    return %arg0, %arg1, %c0_i32 : i32, i32, i32
  }
}

</mosaic_0001>

<bundles_post_ra>
// kernel: tpu_custom_call.1
= control target key start
LH: loop header
LB: loop body
LE: loop exit
PB: predicated region body
PF: predicated region fallthrough
CT: control target
= control target key end

     0   :  { %6 = vsyncpa [#allocation3], 0  ;;  %s102_s0 = inlined_call_operand.hbm [shape: f32[8,128], index: 0, kind: input, shape index: {}]   ;;  %s103_s1 = inlined_call_operand.hbm [shape: f32[8,128], index: 1, kind: output, shape index: {}]  }
   0x1   :  { %7 = vsyncpa [#allocation4], 0  ;;  %s84_s6 = smov [#allocation2]  }
   0x2   :  { %s14_s7 = sshll.u32 %s84_s6, 4  ;;  %s15_s7 = int_to_ptr.vmem [resolvable:$true] %s14_s7 }
   0x3   :  { %s48_s8 = scalar_lea.vmem %s15_s7, 128  ;;  %p53_p1 = scmp.lt.s32.totalorder %s15_s7, %s15_s7 }
   0x4   :  { %p49_p0 = scmp.ne.s32.totalorder %s15_s7, %s48_s8  ;;  %p54_p2 = scmp.lt.s32.totalorder %s48_s8, %s48_s8 }
   0x6   :  { %p55_p3 = por %p54_p2, %p53_p1 }
   0x8   :  { %p56_p4 = pnand %p55_p3, %p49_p0 }
   0xa   :  { %59 = shalt.err (!%p56_p4)
}
   0xb   :  { %17 = dma.hbm_to_vmem [thread:$0]  %s102_s0, 128, %s15_s7, [#allocation3]  }
   0xc   :  { %80 = dma.done.wait [#allocation3], 128  }
   0xd   :  { %81 = vsyncadd [#allocation3], 4294967168  ;;  %s85_s11 = smov [#allocation5]   ;;  %v21_v0 = vld [vmem:[#allocation2] sm:$0xff] }
   0xe   :  { %s29_s12 = sshll.u32 %s85_s11, 4  ;;  %22 = vst [vmem:[#allocation5] sm:$0xff] %v21_v0  ;;  %s30_s12 = int_to_ptr.vmem [resolvable:$true] %s29_s12 }
   0xf   :  { %s60_s13 = scalar_lea.vmem %s30_s12, 128  ;;  %p65_p6 = scmp.lt.s32.totalorder %s30_s12, %s30_s12 }
  0x10   :  { %p61_p5 = scmp.ne.s32.totalorder %s30_s12, %s60_s13  ;;  %p66_p7 = scmp.lt.s32.totalorder %s60_s13, %s60_s13 }
  0x12   :  { %p67_p8 = por %p66_p7, %p65_p6 }
  0x14   :  { %p68_p9 = pnand %p67_p8, %p61_p5 }
  0x16   :  { %71 = shalt.err (!%p68_p9)
}
  0x17   :  { %32 = dma.vmem_to_hbm [thread:$0]  %s30_s12, 128, %s103_s1, [#allocation4]  }
  0x18   :  { %82 = dma.done.wait [#allocation4], 128  }
  0x19   :  { %83 = vsyncadd [#allocation4], 4294967168 }
  0x1a   :  { %36 = vsyncpa [#allocation3], 1 }
  0x1b   :  { %37 = vsyncpa [#allocation4], 1 }

// kernel: tpu_custom_call.1
= control target key start
LH: loop header
LB: loop body
LE: loop exit
PB: predicated region body
PF: predicated region fallthrough
CT: control target
= control target key end

     0   :  { %s1300_s0 = inlined_call_operand.hbm [shape: bf16[2,16,32], index: 0, kind: input, shape index: {}]   ;;  %s1301_s1 = inlined_call_operand.hbm [shape: bf16[32,96], index: 1, kind: input, shape index: {}]   ;;  %s1302_s2 = inlined_call_operand.vmem [shape: f32[1,96], index: 2, kind: input, shape index: {}]   ;;  %s1303_s3 = inlined_call_operand.hbm [shape: bf16[2,16,32], index: 3, kind: output, shape index: {0}]   ;;  %s1304_s4 = inlined_call_operand.hbm [shape: bf16[2,16,32], index: 4, kind: output, shape index: {1}]   ;;  %s1305_s5 = inlined_call_operand.hbm [shape: bf16[2,16,32], index: 5, kind: output, shape index: {2}]  }
   0x1   :  { %1311 = sst [smem:[#allocation16_spill]] %s1301_s1 }
   0x2   :  { %11 = vsyncpa [#allocation3], 0 }
   0x3   :  { %13 = vsyncpa [#allocation3 + $0x1], 0 }
   0x4   :  { %14 = vsyncpa [#allocation6], 0 }
   0x5   :  { %15 = vsyncpa [#allocation4], 0 }
   0x6   :  { %17 = vsyncpa [#allocation4 + $0x1], 0 }
   0x7   :  { %18 = vsyncpa [#allocation9], 0 }
   0x8   :  { %20 = vsyncpa [#allocation9 + $0x1], 0  ;;  %s1023_s18 = smov 0   ;;  %s1025_s19 = smov 0  }
   0x9   :  { %s1027_s20 = smov 0   ;;  %s1029_s21 = smov 0  }
   0xa   :  { %s1031_s22 = smov 0   ;;  %s1033_s23 = smov 0  }
   0xb LB: > { %s1054_s24 = sadd.s32 4294967295, %s979_s23   ;;  %s1306_s25 = sadd.s32 4294967294, %s979_s23   ;;  %s979_s23 = sphi %s1033_s23, %s26_s23   ;;  %s975_s22 = sphi %s1031_s22, %s1334_s22   ;;  %s971_s21 = sphi %s1029_s21, %s1333_s21   ;;  %s967_s20 = sphi %s1027_s20, %s1332_s20   ;;  %s963_s19 = sphi %s1025_s19, %s1331_s19   ;;  %s959_s18 = sphi %s1023_s18, %s1330_s18  }
   0xc   : > { %p60_p0 = scmp.ne.s32.totalorder %s963_s19, %s959_s18  ;;  %p1310_p1 = scmp.eq.s32.totalorder %s1054_s24, 0 }
   0xd   : > { %p134_p3 = scmp.eq.s32.totalorder %s1306_s25, 1  ;;  %p641_p5 = scmp.ge.s32.totalorder %s979_s23, 1 }
   0xe   : > { %p1065_p4 = por %p1310_p1, %p60_p0  ;;  %p197_p7 = scmp.lt.s32.totalorder %s979_s23, 3 }
   0xf   : > { %p1070_p6 = por %p134_p3, %p60_p0  ;;  %s981_s29 = smov [#allocation5]  }
  0x10   : > { %p1075_p8 = pnand %p641_p5, %p197_p7  ;;  %s209_s30 = sshll.u32 %s981_s29, 4  ;;  %s210_s30 = int_to_ptr.vmem [resolvable:$true] %s209_s30 }
  0x11   : > { %s1313_s27 = scalar_select %p1070_p6, 1, 0 }
  0x12   : > { %p704_p9 = pneg %p1075_p8  ;;  %s38_s7 = sadd.s32 1, %s975_s22 }
  0x13   : > { %s796_s8 = scalar_lea.vmem %s210_s30, 256  ;;  %p804_p5 = scmp.lt.s32.totalorder %s210_s30, %s210_s30 }
  0x14   : > { %p1084_p11 = pnand %p704_p9, %p1310_p1  ;;  %p797_p13 = scmp.ne.s32.totalorder %s210_s30, %s796_s8 }
  0x15   : > { %p805_p7 = scmp.lt.s32.totalorder %s796_s8, %s796_s8 }
  0x16   : > { %p787_p12 = pneg %p1084_p11 }
  0x17   : > { %p806_p2 = por %p805_p7, %p804_p5 }
  0x18   : > { %p799_p0 = pnand %p797_p13, %p787_p12 }
  0x1a   : > { %p800_p3 = pneg %p799_p0 }
  0x1c   : > { %p807_p6 = pnand %p806_p2, %p800_p3 }
  0x1e   : > { %810 = shalt.err (!%p807_p6)
}
  0x1f   : > { %s1307_s9 = smov 64   ;;  %s1308_s10 = smov 4  }
  0x20   : > { %s1316_s1 = sld [smem:[#allocation16_spill]]  ;;  %p40_p2 = scmp.ge.s32.totalorder %s38_s7, 2 }
  0x21   : > { %s47_s13 = sadd.s32 1, %s967_s20  ;;  %p54_p6 = scmp.ne.s32.totalorder %s967_s20, %s963_s19 }
  0x22   : > { %p55_p9 = scmp.eq.s32.totalorder %s979_s23, 0  ;;  %s1336_s7 = smov (%p40_p2, %s38_s7), 0 }
  0x23   : > { %1317 = sst [smem:[#allocation15_spill]] %s1336_s7  ;;  %p1319_p13 = scmp.eq.s32.totalorder %s1054_s24, 1 }
  0x24   : > { %p1105_p12 = por %p55_p9, %p54_p6  ;;  %s42_s16 = ssub.s32 %s975_s22, %s1336_s7 }
  0x25   : > { %p1111_p0 = por %p1319_p13, %p54_p6  ;;  %p723_p3 = scmp.lt.s32.totalorder %s979_s23, 2 }
  0x26   : > { %707 = dma.hbm_to_vmem [thread:$0]  (!%p1084_p11), %s1316_s1, 256, %s210_s30, [#allocation6], %s1307_s9, %s1307_s9, %s1308_s10  }
  0x27   : > { %p45_p11 = scmp.eq.s32.totalorder %s42_s16, 0  ;;  %s226_s17 = sand.u32 1, %s967_s20  }
  0x28   : > { %s644_s29 = sshll.u32 %s226_s17, 3  ;;  %s673_s6 = sshll.u32 %s975_s22, 7 }
  0x29   : > { %s1120_s30 = scalar_select %p45_p11, %s967_s20, %s47_s13  }
  0x2a   : > { %s238_s12 = scalar_lea.hbm %s1300_s0, %s673_s6  ;;  %s230_s25 = scalar_lea.vmem [#allocation2], %s644_s29 }
  0x2b   : > { %s239_s9 = sshll.u32 %s230_s25, 4  ;;  %p1128_p5 = pnand %p723_p3, %p1105_p12  ;;  %s240_s9 = int_to_ptr.vmem [resolvable:$true] %s239_s9 }
  0x2c   : > { %s227_s1 = scalar_lea.sflag [#allocation3], %s226_s17  ;;  %s824_s16 = scalar_lea.vmem %s240_s9, 128 }
  0x2d   : > { %p813_p7 = pneg %p1128_p5  ;;  %p825_p2 = scmp.ne.s32.totalorder %s240_s9, %s824_s16 }
  0x2e   : > { %s984_s13 = smov [#allocation2]  }
  0x2f   : > { %p827_p6 = pnand %p825_p2, %p813_p7  ;;  %s829_s7 = sshll.u32 %s984_s13, 4  ;;  %s830_s7 = int_to_ptr.vmem [resolvable:$false] %s829_s7 }
  0x30   : > { %s831_s6 = scalar_lea.vmem %s830_s7, 256  ;;  %p832_p13 = scmp.lt.s32.totalorder %s240_s9, %s830_s7 }
  0x31   : > { %p828_p9 = pneg %p827_p6  ;;  %p833_p11 = scmp.lt.s32.totalorder %s831_s6, %s824_s16 }
  0x33   : > { %p834_p10 = por %p833_p11, %p832_p13 }
  0x35   : > { %p835_p1 = pnand %p834_p10, %p828_p9 }
  0x37   : > { %838 = shalt.err (!%p835_p1)
}
  0x38   : > { %s1322_s25 = smov 4   ;;  %s1323_s14 = smov 64  }
  0x39   : > { %711 = dma.hbm_to_vmem [thread:$0]  (!%p1128_p5), %s238_s12, 128, %s240_s9, %s227_s1, %s1323_s14, %s1323_s14, %s1322_s25  }
  0x3a   : > { %251 = sbr.rel (%p1075_p8) target bundleno = 426 (0x1aa), region = 32  ;;  %s1142_s17 = sand.u32 (!%p1075_p8), 1, %s963_s19  }
  0x3b   : > { %s1145_s7 = sshll.u32 (!%p1075_p8), %s1142_s17, 3  ;;  %s254_s29 = scalar_lea.sflag (!%p1075_p8), [#allocation3], %s1142_s17 }
  0x3c   : > { %s257_s8 = scalar_lea.vmem (!%p1075_p8), [#allocation2], %s1145_s7 }
  0x3f   : > { %942 = dma.done.wait (%p1065_p4), %s254_s29, 128  }
  0x40   : > { %944 = vsyncadd (%p1065_p4), %s254_s29, 4294967168  ;;  %p1324_p1 = scmp.eq.s32.totalorder %s1054_s24, 0 }
  0x42   : > { %946 = dma.done.wait (%p1324_p1), [#allocation6], 256   ;;  %p1325_p8 = pmov %p1324_p1 }
  0x43   : > { %v985_v0 = vmov 0.0   ;;  %vm986_vm0 = vmmov 0   ;;  %v782_v1 = vld [vmem:[#allocation5 + $0x8] sm:$0xff]   ;;  %v783_v2 = vld [vmem:[#allocation5] sm:$0xff]   ;;  %v784_v3 = vld [vmem:[%s257_s8] sm:$0xff]   ;;  %vm333_vm1 = vcmask 261120  }
  0x44   : > { %948 = vsyncadd (%p1325_p8), [#allocation6], 4294967040  ;;  %684 = vmatprep.subr.bf16.mxu0 %v985_v0  ;;  %688 = vmatprep.mubr.msk.bf16.mxu0 %vm986_vm0, %v985_v0  ;;  %v653_v4 = vld [vmem:[%s1302_s2] ss:$0 sm:$0xff]  ;;  %vm388_vm2 = vcmask 257024   ;;  %s987_s28 = smov 64  }
  0x45   : > { %685 = vmatpush3.bf16.msra.mxu0 %v782_v1  ;;  %s988_s9 = smov 96   ;;  %s1162_s10 = sshll.u32 %s971_s21, 7 }
  0x46   : > { %686 = vmatprep.subr.bf16.mxu0 %v985_v0  ;;  %s283_s11 = scalar_lea.vmem [#allocation7], %s1145_s7  ;;  %s1171_s6 = scalar_lea.hbm %s1303_s3, %s1162_s10 }
  0x47   : > { %s439_s12 = sshll.u32 %s283_s11, 4  ;;  %s414_s21 = scalar_lea.sflag [#allocation4], %s1142_s17  ;;  %s1173_s12 = int_to_ptr.vmem [resolvable:$true] %s439_s12 }
  0x48   : > { %s839_s25 = scalar_lea.vmem %s1173_s12, 128  ;;  %s989_s14 = smov [#allocation7]  }
  0x49   : > { %687 = vmatpush3.bf16.msra.mxu0 %v783_v2  ;;  %p840_p4 = scmp.ne.s32.totalorder %s1173_s12, %s839_s25  ;;  %s843_s29 = sshll.u32 %s989_s14, 4  ;;  %s844_s29 = int_to_ptr.vmem [resolvable:$false] %s843_s29 }
  0x4a   : > { %s845_s8 = scalar_lea.vmem %s844_s29, 256  ;;  %p846_p3 = scmp.lt.s32.totalorder %s1173_s12, %s844_s29 }
  0x4b   : > { %p841_p10 = pnand %p840_p4, %p1111_p0  ;;  %p847_p5 = scmp.lt.s32.totalorder %s845_s8, %s839_s25 }
  0x4c   : > { %689 = vmatmul.mubr.msk.bf16.vlgmr.msra.gmra.mxu0 %vm333_vm1, %v784_v3 }
  0x4d   : > { %p842_p12 = pneg %p841_p10  ;;  %p848_p7 = por %p847_p5, %p846_p3 }
  0x4f   : > { %p849_p2 = pnand %p848_p7, %p842_p12 }
 0x10c   : > { %v371_v5 = vpop.f32.mrf.mxu0 }
 0x10d   : > { %v372_v6 = vadd.f32 %v653_v4, %v371_v5 }
 0x10e   : > { %v690_v7 = vpop.f32.mrf.mxu0 }
 0x10f   : > { %v378_v8 = vmul.f32 0.35355338, %v372_v6  ;;  %v676_v9 = vpack.c.bf16 %v372_v6, %v372_v6 }
 0x110   : > { %v374_v10 = vpop.f32.mrf.mxu0 }
 0x111   : > { %v674_v11 = vpack.c.bf16 %v378_v8, %v378_v8  ;;  %v375_v12 = vadd.f32 %v653_v4, %v374_v10  ;;  %405 = vrot.lane.b32.xlu1 %v676_v9, %s987_s28  ;;  %397 = vrot.lane.b32.xlu0 %v676_v9, %s988_s9 }
 0x112   : > { %v691_v13 = vpop.f32.mrf.mxu0 }
 0x113   : > { %389 = vst.msk [vmem:[%s283_s11] sm:$0xf] %vm388_vm2, %v674_v11  ;;  %v379_v14 = vmul.f32 0.35355338, %v375_v12  ;;  %v677_v15 = vpack.c.bf16 %v375_v12, %v375_v12 }
 0x115   : > { %v675_v16 = vpack.c.bf16 %v379_v14, %v379_v14  ;;  %407 = vrot.lane.b32.xlu1 %v677_v15, %s987_s28  ;;  %399 = vrot.lane.b32.xlu0 %v677_v15, %s988_s9 }
 0x117   : > { %390 = vst.msk [vmem:[%s283_s11 + $0x4] sm:$0xf] %vm388_vm2, %v675_v16 }
 0x118   : > { %852 = shalt.err (!%p849_p2)
}
 0x119   : > { %s853_s1 = scalar_lea.hbm %s1171_s6, 128  ;;  %s857_s11 = scalar_lea.hbm %s1303_s3, 256 }
 0x11a   : > { %p854_p6 = scmp.ne.s32.totalorder %s1171_s6, %s853_s1  ;;  %p858_p11 = scmp.lt.s32.totalorder %s1171_s6, %s1303_s3 }
 0x11b   : > { %p859_p1 = scmp.lt.s32.totalorder %s857_s11, %s853_s1 }
 0x11c   : > { %p855_p9 = pnand %p854_p6, %p1111_p0 }
 0x11d   : > { %p860_p8 = por %p859_p1, %p858_p11 }
 0x11e   : > { %p856_p13 = pneg %p855_p9 }
 0x120   : > { %p861_p4 = pnand %p860_p8, %p856_p13 }
 0x122   : > { %864 = shalt.err (!%p861_p4)
}
 0x123   : > { %s990_s25 = smov 4   ;;  %s290_s14 = scalar_lea.vmem [#allocation8], %s1145_s7 }
 0x124   : > { %698 = dma.vmem_to_hbm [thread:$0]  (%p1111_p0), %s1173_s12, 128, %s1171_s6, %s414_s21, %s987_s28, %s987_s28, %s990_s25  }
 0x125   : > { %s457_s29 = sshll.u32 %s290_s14, 4  ;;  %s418_s8 = sand.u32 1, %s1054_s24   ;;  %s1207_s29 = int_to_ptr.vmem [resolvable:$true] %s457_s29 }
 0x126   : > { %s297_s1 = scalar_lea.vmem [#allocation10], %s1145_s7  ;;  %s1213_s12 = scalar_lea.hbm %s1304_s4, %s1162_s10 }
 0x127   : > { %s475_s26 = sshll.u32 %s297_s1, 4  ;;  %s1221_s6 = scalar_lea.hbm %s1305_s5, %s1162_s10  ;;  %s1215_s26 = int_to_ptr.vmem [resolvable:$true] %s475_s26 }
 0x128   : > { %s1225_s21 = scalar_lea.sflag [#allocation9], %s418_s8  ;;  %s865_s11 = scalar_lea.vmem %s1207_s29, 128 }
 0x129   : > { %p866_p10 = scmp.ne.s32.totalorder %s1207_s29, %s865_s11  ;;  %s991_s16 = smov [#allocation8]  }
 0x12a   : > { %s869_s13 = sshll.u32 %s991_s16, 4  ;;  %s870_s13 = int_to_ptr.vmem [resolvable:$false] %s869_s13 }
 0x12b   : > { %p867_p12 = pnand %p866_p10, %p1111_p0  ;;  %s871_s17 = scalar_lea.vmem %s870_s13, 256 }
 0x12c   : > { %p872_p5 = scmp.lt.s32.totalorder %s1207_s29, %s870_s13  ;;  %p873_p7 = scmp.lt.s32.totalorder %s871_s17, %s865_s11 }
 0x12d   : > { %p868_p3 = pneg %p867_p12 }
 0x12e   : > { %p874_p2 = por %p873_p7, %p872_p5 }
 0x130   : > { %p875_p6 = pnand %p874_p2, %p868_p3 }
 0x183   : > { %v406_v17 = vpop.permute.xlu1 %405  ;;  %v398_v18 = vpop.permute.xlu0 %397 }
 0x184   : > { %411 = vst.msk [vmem:[%s297_s1] sm:$0xf] %vm388_vm2, %v406_v17  ;;  %403 = vst.msk [vmem:[%s290_s14] sm:$0xf] %vm388_vm2, %v398_v18 }
 0x187   : > { %v408_v19 = vpop.permute.xlu1 %407  ;;  %v400_v20 = vpop.permute.xlu0 %399 }
 0x188   : > { %412 = vst.msk [vmem:[%s297_s1 + $0x4] sm:$0xf] %vm388_vm2, %v408_v19  ;;  %404 = vst.msk [vmem:[%s290_s14 + $0x4] sm:$0xf] %vm388_vm2, %v400_v20 }
 0x189   : > { %878 = shalt.err (!%p875_p6)
}
 0x18a   : > { %s879_s10 = scalar_lea.hbm %s1213_s12, 128  ;;  %s883_s1 = scalar_lea.hbm %s1304_s4, 256 }
 0x18b   : > { %p880_p9 = scmp.ne.s32.totalorder %s1213_s12, %s879_s10  ;;  %p884_p1 = scmp.lt.s32.totalorder %s1213_s12, %s1304_s4 }
 0x18c   : > { %p885_p8 = scmp.lt.s32.totalorder %s883_s1, %s879_s10 }
 0x18d   : > { %p881_p13 = pnand %p880_p9, %p1111_p0 }
 0x18e   : > { %p886_p4 = por %p885_p8, %p884_p1 }
 0x18f   : > { %p882_p11 = pneg %p881_p13 }
 0x191   : > { %p887_p10 = pnand %p886_p4, %p882_p11 }
 0x193   : > { %890 = shalt.err (!%p887_p10)
}
 0x194   : > { %699 = dma.vmem_to_hbm [thread:$0]  (%p1111_p0), %s1207_s29, 128, %s1213_s12, %s1225_s21, %s987_s28, %s987_s28, %s990_s25  }
 0x195   : > { %s891_s7 = scalar_lea.vmem %s1215_s26, 128  ;;  %s992_s11 = smov [#allocation10]  }
 0x196   : > { %p892_p12 = scmp.ne.s32.totalorder %s1215_s26, %s891_s7  ;;  %s895_s16 = sshll.u32 %s992_s11, 4  ;;  %s896_s16 = int_to_ptr.vmem [resolvable:$false] %s895_s16 }
 0x197   : > { %s897_s13 = scalar_lea.vmem %s896_s16, 256  ;;  %p898_p7 = scmp.lt.s32.totalorder %s1215_s26, %s896_s16 }
 0x198   : > { %p893_p3 = pnand %p892_p12, %p1111_p0  ;;  %p899_p2 = scmp.lt.s32.totalorder %s897_s13, %s891_s7 }
 0x19a   : > { %p894_p5 = pneg %p893_p3  ;;  %p900_p6 = por %p899_p2, %p898_p7 }
 0x19c   : > { %p901_p9 = pnand %p900_p6, %p894_p5 }
 0x19e   : > { %904 = shalt.err (!%p901_p9)
}
 0x19f   : > { %s905_s17 = scalar_lea.hbm %s1221_s6, 128  ;;  %s909_s10 = scalar_lea.hbm %s1305_s5, 256 }
 0x1a0   : > { %p906_p13 = scmp.ne.s32.totalorder %s1221_s6, %s905_s17  ;;  %p910_p8 = scmp.lt.s32.totalorder %s1221_s6, %s1305_s5 }
 0x1a1   : > { %p911_p4 = scmp.lt.s32.totalorder %s909_s10, %s905_s17 }
 0x1a2   : > { %p907_p11 = pnand %p906_p13, %p1111_p0 }
 0x1a3   : > { %p912_p10 = por %p911_p4, %p910_p8 }
 0x1a4   : > { %p908_p1 = pneg %p907_p11 }
 0x1a6   : > { %p913_p12 = pnand %p912_p10, %p908_p1 }
 0x1a8   : > { %916 = shalt.err (!%p913_p12)
}
 0x1a9   : > { %700 = dma.vmem_to_hbm [thread:$0]  (%p1111_p0), %s1215_s26, 128, %s1221_s6, %s1225_s21, %s987_s28, %s987_s28, %s990_s25  }
 0x1aa PF: > { %s490_s1 = sand.u32 1, %s959_s18   ;;  %p1326_p3 = scmp.ne.s32.totalorder %s1313_s27, 0 }
 0x1ab   : > { %p1327_p5 = scmp.ge.s32.totalorder %s979_s23, 2  ;;  %s491_s9 = scalar_lea.sflag [#allocation4], %s490_s1 }
 0x1ad   : > { %p713_p7 = pnand %p1327_p5, %p1326_p3 }
 0x1af   : > { %p714_p2 = pneg %p713_p7 }
 0x1b1   : > { %950 = dma.done.wait (%p714_p2), %s491_s9, 128  }
 0x1b2   : > { %952 = vsyncadd (%p714_p2), %s491_s9, 4294967168  ;;  %s1328_s15 = sadd.s32 4294967294, %s979_s23  }
 0x1b3   : > { %s499_s24 = sand.u32 1, %s1328_s15  }
 0x1b4   : > { %s500_s7 = scalar_lea.sflag [#allocation9], %s499_s24 }
 0x1b5   : > { %954 = dma.done.wait (%p714_p2), %s500_s7, 256  }
 0x1b6   : > { %956 = vsyncadd (%p714_p2), %s500_s7, 4294967040  ;;  %s26_s23 = sadd.s32 1, %s979_s23   ;;  %s1329_s27 = sld [smem:[#allocation15_spill]] }
 0x1b7   : > { %p23_p0 = scmp.ge.s32.totalorder %s26_s23, 4   ;;  %s1330_s18 = smov %s963_s19 }
 0x1b8   : > { %s1331_s19 = smov %s967_s20  ;;  %s1332_s20 = smov %s1120_s30 }
 0x1b9   : > { %s1333_s21 = smov %s975_s22  ;;  %25 = sbr.rel (!%p23_p0) target bundleno = 11 (0xb), region = 113 }
 0x1bc   : > { %s1334_s22 = smov %s1329_s27 }
 0x1be   :  { %514 = vsyncpa [#allocation3], 1 }
 0x1bf   :  { %516 = vsyncpa [#allocation3 + $0x1], 1 }
 0x1c0   :  { %517 = vsyncpa [#allocation6], 1 }
 0x1c1   :  { %518 = vsyncpa [#allocation4], 1 }
 0x1c2   :  { %520 = vsyncpa [#allocation4 + $0x1], 1 }
 0x1c3   :  { %521 = vsyncpa [#allocation9], 1 }
 0x1c4   :  { %523 = vsyncpa [#allocation9 + $0x1], 1 }

</bundles_post_ra>
